<compile_context>
chip_gen: v6e
topology: v6e:2x2x1
jax: 0.10.0
libtpu: 0.0.40
codegen_flags: <defaults>
</compile_context>

<pallas_src>
import functools
import math

import jax
import jax.numpy as jnp
from jax.experimental import pallas as pl
from jax.experimental.pallas import tpu as pltpu


def _bert_embedding_kernel(seq_len, tile_seq,
                           ids_ref,       # SMEM (N,) int32   (scalar prefetch)
                           tok_hbm,       # HBM  (V, E)       (memory_space=pl.ANY)
                           seg_tab_ref,   # VMEM (8, E)       (resident, row0 = pad)
                           seg_ref,       # VMEM (TS, 1) int32
                           pe_ref,        # VMEM (TS, E)      (fetched once per si)
                           out_ref,       # VMEM (TS, E) f32
                           rows_ref,      # VMEM scratch (2, TS, E) gather double buffer
                           dma_sem):      # DMA semaphores (2,)
    si = pl.program_id(0)
    bi = pl.program_id(1)
    n_b = pl.num_programs(1)
    slot = bi % 2

    def issue_gather(batch_idx, slot_idx):
        base = batch_idx * seq_len + si * tile_seq

        @pl.loop(0, tile_seq, unroll=(tile_seq <= 128))
        def _issue(r):
            tok = ids_ref[base + r]
            pltpu.make_async_copy(tok_hbm.at[pl.ds(tok, 1), :],
                                  rows_ref.at[slot_idx, pl.ds(r, 1), :],
                                  dma_sem.at[slot_idx]).start()

    # Prime the double buffer at the start of every batch sweep (bi == 0); this
    # is correct on every TensorCore even when the outer axis is megacore-split.
    @pl.when(bi == 0)
    def _prime():
        issue_gather(0, 0)

    # Prefetch the next batch element's token rows into the other slot so their
    # DMA latency hides under this step's drain / compute / writeback.
    @pl.when(bi + 1 < n_b)
    def _prefetch():
        issue_gather(bi + 1, 1 - slot)

    # Single full-tile wait: DMA semaphores count bytes and every row copy has
    # identical (1, E) size and dtype, so waiting for tile_seq*E*itemsize bytes
    # drains all outstanding gathers for the current slot.
    pltpu.make_async_copy(tok_hbm.at[pl.ds(0, tile_seq), :],
                          rows_ref.at[slot],
                          dma_sem.at[slot]).wait()

    # Segment embedding via VPU selects (0 = pad, 1 = sent_A, 2 = sent_B).
    segs = seg_ref[...]                                   # (TS, 1) int32
    row_a = seg_tab_ref[pl.ds(1, 1), :]                   # (1, E)
    row_b = seg_tab_ref[pl.ds(2, 1), :]                   # (1, E)
    seg_emb = (jnp.where(segs == 1, row_a, 0.0).astype(jnp.float32)
               + jnp.where(segs == 2, row_b, 0.0).astype(jnp.float32))

    # Sum (always accumulated in f32, regardless of table storage dtype).
    out_ref[...] = (rows_ref[slot].astype(jnp.float32)
                    + seg_emb
                    + pe_ref[...].astype(jnp.float32))
    # TODO(synk): dropout (p=0.1) omitted (inference semantics); a training
    # variant would use pltpu.prng_seed + pltpu.stateful_bernoulli here.


def _sinusoidal_pe(seq_len: int, d_model: int) -> jnp.ndarray:
    """Matches PositionalEmbedding from BERT-pytorch (sin on even, cos on odd)."""
    position = jnp.arange(seq_len, dtype=jnp.float32)[:, None]            # (S, 1)
    div_term = jnp.exp(jnp.arange(0, d_model, 2, dtype=jnp.float32)
                       * -(math.log(10000.0) / d_model))                  # (E/2,)
    pe = jnp.zeros((seq_len, d_model), dtype=jnp.float32)
    pe = pe.at[:, 0::2].set(jnp.sin(position * div_term))
    pe = pe.at[:, 1::2].set(jnp.cos(position * div_term))
    return pe


@functools.partial(jax.jit, static_argnames=("tile_seq",))
def bert_embedding(sequence, segment_label, token_table, segment_table,
                   *, tile_seq=None):
    """sequence, segment_label: (B, S) int32; returns (B, S, E) float32."""
    bsz, seq = sequence.shape
    vocab, embed = token_table.shape
    assert embed % 128 == 0, "embed dim must be a multiple of 128 (lane-dense out)"

    if tile_seq is None:
        tile_seq = min(seq, 512)      # big tiles amortize ~0.35us per-grid-step overhead
    assert seq % tile_seq == 0 and tile_seq % 8 == 0
    assert vocab >= tile_seq, "full-tile drain descriptor slices the first tile_seq rows"
    seq_tiles = seq // tile_seq
    n = bsz * seq
    itemsize = jnp.dtype(token_table.dtype).itemsize

    ids_flat = sequence.reshape(n).astype(jnp.int32)        # SMEM scalar prefetch
    segs_2d = segment_label.reshape(n, 1).astype(jnp.int32)

    # Pad segment table to 8 rows (sublane multiple); extra rows are never read.
    seg_rows = segment_table.shape[0]
    if seg_rows < 8:
        segment_table = jnp.pad(segment_table, ((0, 8 - seg_rows), (0, 0)))

    # Positional encoding computed once in f32, stored in the table's dtype so
    # its single HBM stream shrinks alongside a bf16 token table.
    pe = _sinusoidal_pe(seq, embed).astype(token_table.dtype)

    kernel = functools.partial(_bert_embedding_kernel, seq, tile_seq)

    grid_spec = pltpu.PrefetchScalarGridSpec(
        num_scalar_prefetch=1,
        grid=(seq_tiles, bsz),                    # batch innermost -> pe block reused
        in_specs=[
            pl.BlockSpec(memory_space=pl.ANY),                             # token table (HBM)
            pl.BlockSpec((8, embed), lambda si, bi, ids: (0, 0)),          # segment table
            pl.BlockSpec((tile_seq, 1),
                         lambda si, bi, ids: (bi * seq_tiles + si, 0)),    # segment labels
            pl.BlockSpec((tile_seq, embed),
                         lambda si, bi, ids: (si, 0)),                     # positional encoding
        ],
        out_specs=pl.BlockSpec((tile_seq, embed),
                               lambda si, bi, ids: (bi * seq_tiles + si, 0)),
        scratch_shapes=[
            pltpu.VMEM((2, tile_seq, embed), token_table.dtype),  # gather double buffer
            pltpu.SemaphoreType.DMA((2,)),
        ],
    )

    # Explicit VMEM budget: rows double buffer + pipelined pe/out/seg blocks.
    vmem_need = (2 * tile_seq * embed * itemsize          # rows_ref scratch
                 + 2 * tile_seq * embed * itemsize        # pe (double-buffered)
                 + 2 * tile_seq * embed * 4               # out (double-buffered)
                 + 2 * tile_seq * 128 * 4                 # segment labels (lane-padded)
                 + 2 * 8 * embed * itemsize)              # segment table
    vmem_limit = int(max(32 << 20, min(2 * vmem_need, 48 << 20)))

    cost = pl.CostEstimate(
        flops=3 * n * embed,
        transcendentals=0,
        bytes_accessed=(n * embed * itemsize       # gathered token rows
                        + n * embed * 4            # f32 output
                        + seq * embed * itemsize   # positional encoding (fetched once)
                        + 8 * embed * itemsize     # segment table
                        + 2 * n * 4))              # ids + segment labels

    out = pl.pallas_call(
        kernel,
        out_shape=jax.ShapeDtypeStruct((n, embed), jnp.float32),
        grid_spec=grid_spec,
        compiler_params=pltpu.CompilerParams(
            dimension_semantics=("parallel", "arbitrary"),
            vmem_limit_bytes=vmem_limit),
        cost_estimate=cost,
    )(ids_flat, token_table, segment_table, segs_2d, pe)

    return out.reshape(bsz, seq, embed)


if __name__ == "__main__":
    def reference(sequence, segment_label, token_table, segment_table):
        pe = _sinusoidal_pe(sequence.shape[1],
                            token_table.shape[1]).astype(token_table.dtype)
        return (token_table[sequence].astype(jnp.float32)
                + segment_table[segment_label].astype(jnp.float32)
                + pe[None].astype(jnp.float32))

    key = jax.random.PRNGKey(0)
    k_tok, k_seg, k_ids, k_lbl = jax.random.split(key, 4)

    # --- Test 1: module-faithful f32; B=2, S=8, E=128, V=64. ---
    BATCH, SEQ, EMBED, VOCAB = 2, 8, 128, 64
    token_table = jax.random.normal(k_tok, (VOCAB, EMBED), dtype=jnp.float32)
    token_table = token_table.at[0].set(0.0)                   # padding_idx=0
    segment_table = jnp.zeros((3, EMBED), dtype=jnp.float32)   # 0=pad, 1=A, 2=B
    segment_table = segment_table.at[1:3].set(
        jax.random.normal(k_seg, (2, EMBED), dtype=jnp.float32))
    sequence = jax.random.randint(k_ids, (BATCH, SEQ), 0, VOCAB, dtype=jnp.int32)
    segment_label = jax.random.randint(k_lbl, (BATCH, SEQ), 0, 3, dtype=jnp.int32)

    out = bert_embedding(sequence, segment_label, token_table, segment_table)
    jax.block_until_ready(out)
    ref = reference(sequence, segment_label, token_table, segment_table)
    assert out.shape == (BATCH, SEQ, EMBED)
    assert jnp.allclose(out, ref, atol=1e-5, rtol=1e-5)

    # --- Test 2: multi-tile sequence + odd batch (exercises pe reuse along the
    #     inner batch axis and the cross-step gather double buffer handoff). ---
    B2, S2 = 3, 16
    seq2 = jax.random.randint(jax.random.PRNGKey(1), (B2, S2), 0, VOCAB,
                              dtype=jnp.int32)
    lbl2 = jax.random.randint(jax.random.PRNGKey(2), (B2, S2), 0, 3,
                              dtype=jnp.int32)
    out2 = bert_embedding(seq2, lbl2, token_table, segment_table, tile_seq=8)
    jax.block_until_ready(out2)
    ref2 = reference(seq2, lbl2, token_table, segment_table)
    assert out2.shape == (B2, S2, EMBED)
    assert jnp.allclose(out2, ref2, atol=1e-5, rtol=1e-5)

    print("KERNEL_OK")
</pallas_src>

<mosaic_0001>
module attributes {stable_mosaic.version = 11 : i64} {
  func.func @_bert_embedding_kernel(%arg0: i32, %arg1: i32, %arg2: memref<16xi32, #tpu.memory_space<smem>>, %arg3: memref<64x128xf32, #tpu.memory_space<any>>, %arg4: memref<8x128xf32, #tpu.memory_space<vmem>>, %arg5: memref<8x1xi32, #tpu.memory_space<vmem>>, %arg6: memref<8x128xf32, #tpu.memory_space<vmem>>, %arg7: memref<8x128xf32, #tpu.memory_space<vmem>>, %arg8: memref<2x8x128xf32, #tpu.memory_space<vmem>>, %arg9: memref<2x!tpu.dma_semaphore, #tpu.memory_space<semaphore_mem>>) attributes {dimension_semantics = [#tpu.dimension_semantics<parallel>, #tpu.dimension_semantics<arbitrary>], iteration_bounds = array<i64: 1, 2>, scalar_prefetch = 1 : i64, scratch_operands = 2 : i64, tpu.core_type = #tpu.core_type<tc>, window_params = [{}, {pipeline_mode = #tpu.pipeline_mode<synchronous>, transform_indices = @transform_1, window_bounds = array<i64: 8, 128>}, {transform_indices = @transform_2, window_bounds = array<i64: 8, 1>}, {transform_indices = @transform_3, window_bounds = array<i64: 8, 128>}, {transform_indices = @transform_4, window_bounds = array<i64: 8, 128>}]} {
    %c2_i32 = arith.constant 2 : i32
    %c0_i32 = arith.constant 0 : i32
    %0 = arith.cmpi eq, %c2_i32, %c0_i32 : i32
    %c1_i32 = arith.constant 1 : i32
    %1 = arith.select %0, %c1_i32, %c2_i32 : i32
    %2 = arith.remsi %arg1, %1 : i32
    %c0_i32_0 = arith.constant 0 : i32
    %3 = arith.cmpi ne, %2, %c0_i32_0 : i32
    %c0_i32_1 = arith.constant 0 : i32
    %4 = arith.cmpi slt, %2, %c0_i32_1 : i32
    %c0_i32_2 = arith.constant 0 : i32
    %5 = arith.cmpi slt, %1, %c0_i32_2 : i32
    %6 = arith.xori %4, %5 : i1
    %7 = arith.andi %6, %3 : i1
    %8 = arith.addi %2, %1 : i32
    %9 = arith.select %7, %8, %2 : i32
    %c0_i32_3 = arith.constant 0 : i32
    %10 = arith.cmpi eq, %arg1, %c0_i32_3 : i32
    %11 = arith.extui %10 : i1 to i32
    %c0_i32_4 = arith.constant 0 : i32
    %12 = arith.cmpi ne, %11, %c0_i32_4 : i32
    scf.if %12 {
      %c8_i32 = arith.constant 8 : i32
      %49 = arith.muli %arg0, %c8_i32 : i32
      %c0_i32_24 = arith.constant 0 : i32
      %50 = arith.addi %c0_i32_24, %49 : i32
      %c0_i32_25 = arith.constant 0 : i32
      %c1_i32_26 = arith.constant 1 : i32
      %51 = arith.muli %c0_i32_25, %c1_i32_26 : i32
      %c0_i32_27 = arith.constant 0 : i32
      %52 = arith.addi %c0_i32_27, %51 : i32
      %53 = arith.addi %50, %52 : i32
      %54 = arith.index_cast %53 : i32 to index
      %55 = memref.load %arg2[%54] : memref<16xi32, #tpu.memory_space<smem>>
      %c0_i32_28 = arith.constant 0 : i32
      %c0_i32_29 = arith.constant 0 : i32
      %c0_i32_30 = arith.constant 0 : i32
      %56 = tpu.memref_slice %arg3[%55, %c0_i32_30] : memref<64x128xf32, #tpu.memory_space<any>> -> memref<1x128xf32, #tpu.memory_space<any>>
      %c0_i32_31 = arith.constant 0 : i32
      %57 = tpu.memref_slice %arg8[%c0_i32_28, %52, %c0_i32_31] : memref<2x8x128xf32, #tpu.memory_space<vmem>> -> memref<1x1x128xf32, #tpu.memory_space<vmem>>
      %58 = tpu.memref_squeeze %57 : memref<1x1x128xf32, #tpu.memory_space<vmem>> -> memref<1x128xf32, #tpu.memory_space<vmem>>
      %59 = tpu.memref_slice %arg9[%c0_i32_29] : memref<2x!tpu.dma_semaphore, #tpu.memory_space<semaphore_mem>> -> memref<1x!tpu.dma_semaphore, #tpu.memory_space<semaphore_mem>>
      %60 = tpu.memref_squeeze %59 : memref<1x!tpu.dma_semaphore, #tpu.memory_space<semaphore_mem>> -> memref<!tpu.dma_semaphore, #tpu.memory_space<semaphore_mem>>
      tpu.enqueue_dma source(%56 : memref<1x128xf32, #tpu.memory_space<any>>) target(%58 : memref<1x128xf32, #tpu.memory_space<vmem>>) target_semaphore(%60 : memref<!tpu.dma_semaphore, #tpu.memory_space<semaphore_mem>>)
      %c1_i32_32 = arith.constant 1 : i32
      %c1_i32_33 = arith.constant 1 : i32
      %61 = arith.muli %c1_i32_32, %c1_i32_33 : i32
      %c0_i32_34 = arith.constant 0 : i32
      %62 = arith.addi %c0_i32_34, %61 : i32
      %63 = arith.addi %50, %62 : i32
      %64 = arith.index_cast %63 : i32 to index
      %65 = memref.load %arg2[%64] : memref<16xi32, #tpu.memory_space<smem>>
      %c0_i32_35 = arith.constant 0 : i32
      %c0_i32_36 = arith.constant 0 : i32
      %c0_i32_37 = arith.constant 0 : i32
      %66 = tpu.memref_slice %arg3[%65, %c0_i32_37] : memref<64x128xf32, #tpu.memory_space<any>> -> memref<1x128xf32, #tpu.memory_space<any>>
      %c0_i32_38 = arith.constant 0 : i32
      %67 = tpu.memref_slice %arg8[%c0_i32_35, %62, %c0_i32_38] : memref<2x8x128xf32, #tpu.memory_space<vmem>> -> memref<1x1x128xf32, #tpu.memory_space<vmem>>
      %68 = tpu.memref_squeeze %67 : memref<1x1x128xf32, #tpu.memory_space<vmem>> -> memref<1x128xf32, #tpu.memory_space<vmem>>
      %69 = tpu.memref_slice %arg9[%c0_i32_36] : memref<2x!tpu.dma_semaphore, #tpu.memory_space<semaphore_mem>> -> memref<1x!tpu.dma_semaphore, #tpu.memory_space<semaphore_mem>>
      %70 = tpu.memref_squeeze %69 : memref<1x!tpu.dma_semaphore, #tpu.memory_space<semaphore_mem>> -> memref<!tpu.dma_semaphore, #tpu.memory_space<semaphore_mem>>
      tpu.enqueue_dma source(%66 : memref<1x128xf32, #tpu.memory_space<any>>) target(%68 : memref<1x128xf32, #tpu.memory_space<vmem>>) target_semaphore(%70 : memref<!tpu.dma_semaphore, #tpu.memory_space<semaphore_mem>>)
      %c2_i32_39 = arith.constant 2 : i32
      %c1_i32_40 = arith.constant 1 : i32
      %71 = arith.muli %c2_i32_39, %c1_i32_40 : i32
      %c0_i32_41 = arith.constant 0 : i32
      %72 = arith.addi %c0_i32_41, %71 : i32
      %73 = arith.addi %50, %72 : i32
      %74 = arith.index_cast %73 : i32 to index
      %75 = memref.load %arg2[%74] : memref<16xi32, #tpu.memory_space<smem>>
      %c0_i32_42 = arith.constant 0 : i32
      %c0_i32_43 = arith.constant 0 : i32
      %c0_i32_44 = arith.constant 0 : i32
      %76 = tpu.memref_slice %arg3[%75, %c0_i32_44] : memref<64x128xf32, #tpu.memory_space<any>> -> memref<1x128xf32, #tpu.memory_space<any>>
      %c0_i32_45 = arith.constant 0 : i32
      %77 = tpu.memref_slice %arg8[%c0_i32_42, %72, %c0_i32_45] : memref<2x8x128xf32, #tpu.memory_space<vmem>> -> memref<1x1x128xf32, #tpu.memory_space<vmem>>
      %78 = tpu.memref_squeeze %77 : memref<1x1x128xf32, #tpu.memory_space<vmem>> -> memref<1x128xf32, #tpu.memory_space<vmem>>
      %79 = tpu.memref_slice %arg9[%c0_i32_43] : memref<2x!tpu.dma_semaphore, #tpu.memory_space<semaphore_mem>> -> memref<1x!tpu.dma_semaphore, #tpu.memory_space<semaphore_mem>>
      %80 = tpu.memref_squeeze %79 : memref<1x!tpu.dma_semaphore, #tpu.memory_space<semaphore_mem>> -> memref<!tpu.dma_semaphore, #tpu.memory_space<semaphore_mem>>
      tpu.enqueue_dma source(%76 : memref<1x128xf32, #tpu.memory_space<any>>) target(%78 : memref<1x128xf32, #tpu.memory_space<vmem>>) target_semaphore(%80 : memref<!tpu.dma_semaphore, #tpu.memory_space<semaphore_mem>>)
      %c3_i32 = arith.constant 3 : i32
      %c1_i32_46 = arith.constant 1 : i32
      %81 = arith.muli %c3_i32, %c1_i32_46 : i32
      %c0_i32_47 = arith.constant 0 : i32
      %82 = arith.addi %c0_i32_47, %81 : i32
      %83 = arith.addi %50, %82 : i32
      %84 = arith.index_cast %83 : i32 to index
      %85 = memref.load %arg2[%84] : memref<16xi32, #tpu.memory_space<smem>>
      %c0_i32_48 = arith.constant 0 : i32
      %c0_i32_49 = arith.constant 0 : i32
      %c0_i32_50 = arith.constant 0 : i32
      %86 = tpu.memref_slice %arg3[%85, %c0_i32_50] : memref<64x128xf32, #tpu.memory_space<any>> -> memref<1x128xf32, #tpu.memory_space<any>>
      %c0_i32_51 = arith.constant 0 : i32
      %87 = tpu.memref_slice %arg8[%c0_i32_48, %82, %c0_i32_51] : memref<2x8x128xf32, #tpu.memory_space<vmem>> -> memref<1x1x128xf32, #tpu.memory_space<vmem>>
      %88 = tpu.memref_squeeze %87 : memref<1x1x128xf32, #tpu.memory_space<vmem>> -> memref<1x128xf32, #tpu.memory_space<vmem>>
      %89 = tpu.memref_slice %arg9[%c0_i32_49] : memref<2x!tpu.dma_semaphore, #tpu.memory_space<semaphore_mem>> -> memref<1x!tpu.dma_semaphore, #tpu.memory_space<semaphore_mem>>
      %90 = tpu.memref_squeeze %89 : memref<1x!tpu.dma_semaphore, #tpu.memory_space<semaphore_mem>> -> memref<!tpu.dma_semaphore, #tpu.memory_space<semaphore_mem>>
      tpu.enqueue_dma source(%86 : memref<1x128xf32, #tpu.memory_space<any>>) target(%88 : memref<1x128xf32, #tpu.memory_space<vmem>>) target_semaphore(%90 : memref<!tpu.dma_semaphore, #tpu.memory_space<semaphore_mem>>)
      %c4_i32 = arith.constant 4 : i32
      %c1_i32_52 = arith.constant 1 : i32
      %91 = arith.muli %c4_i32, %c1_i32_52 : i32
      %c0_i32_53 = arith.constant 0 : i32
      %92 = arith.addi %c0_i32_53, %91 : i32
      %93 = arith.addi %50, %92 : i32
      %94 = arith.index_cast %93 : i32 to index
      %95 = memref.load %arg2[%94] : memref<16xi32, #tpu.memory_space<smem>>
      %c0_i32_54 = arith.constant 0 : i32
      %c0_i32_55 = arith.constant 0 : i32
      %c0_i32_56 = arith.constant 0 : i32
      %96 = tpu.memref_slice %arg3[%95, %c0_i32_56] : memref<64x128xf32, #tpu.memory_space<any>> -> memref<1x128xf32, #tpu.memory_space<any>>
      %c0_i32_57 = arith.constant 0 : i32
      %97 = tpu.memref_slice %arg8[%c0_i32_54, %92, %c0_i32_57] : memref<2x8x128xf32, #tpu.memory_space<vmem>> -> memref<1x1x128xf32, #tpu.memory_space<vmem>>
      %98 = tpu.memref_squeeze %97 : memref<1x1x128xf32, #tpu.memory_space<vmem>> -> memref<1x128xf32, #tpu.memory_space<vmem>>
      %99 = tpu.memref_slice %arg9[%c0_i32_55] : memref<2x!tpu.dma_semaphore, #tpu.memory_space<semaphore_mem>> -> memref<1x!tpu.dma_semaphore, #tpu.memory_space<semaphore_mem>>
      %100 = tpu.memref_squeeze %99 : memref<1x!tpu.dma_semaphore, #tpu.memory_space<semaphore_mem>> -> memref<!tpu.dma_semaphore, #tpu.memory_space<semaphore_mem>>
      tpu.enqueue_dma source(%96 : memref<1x128xf32, #tpu.memory_space<any>>) target(%98 : memref<1x128xf32, #tpu.memory_space<vmem>>) target_semaphore(%100 : memref<!tpu.dma_semaphore, #tpu.memory_space<semaphore_mem>>)
      %c5_i32 = arith.constant 5 : i32
      %c1_i32_58 = arith.constant 1 : i32
      %101 = arith.muli %c5_i32, %c1_i32_58 : i32
      %c0_i32_59 = arith.constant 0 : i32
      %102 = arith.addi %c0_i32_59, %101 : i32
      %103 = arith.addi %50, %102 : i32
      %104 = arith.index_cast %103 : i32 to index
      %105 = memref.load %arg2[%104] : memref<16xi32, #tpu.memory_space<smem>>
      %c0_i32_60 = arith.constant 0 : i32
      %c0_i32_61 = arith.constant 0 : i32
      %c0_i32_62 = arith.constant 0 : i32
      %106 = tpu.memref_slice %arg3[%105, %c0_i32_62] : memref<64x128xf32, #tpu.memory_space<any>> -> memref<1x128xf32, #tpu.memory_space<any>>
      %c0_i32_63 = arith.constant 0 : i32
      %107 = tpu.memref_slice %arg8[%c0_i32_60, %102, %c0_i32_63] : memref<2x8x128xf32, #tpu.memory_space<vmem>> -> memref<1x1x128xf32, #tpu.memory_space<vmem>>
      %108 = tpu.memref_squeeze %107 : memref<1x1x128xf32, #tpu.memory_space<vmem>> -> memref<1x128xf32, #tpu.memory_space<vmem>>
      %109 = tpu.memref_slice %arg9[%c0_i32_61] : memref<2x!tpu.dma_semaphore, #tpu.memory_space<semaphore_mem>> -> memref<1x!tpu.dma_semaphore, #tpu.memory_space<semaphore_mem>>
      %110 = tpu.memref_squeeze %109 : memref<1x!tpu.dma_semaphore, #tpu.memory_space<semaphore_mem>> -> memref<!tpu.dma_semaphore, #tpu.memory_space<semaphore_mem>>
      tpu.enqueue_dma source(%106 : memref<1x128xf32, #tpu.memory_space<any>>) target(%108 : memref<1x128xf32, #tpu.memory_space<vmem>>) target_semaphore(%110 : memref<!tpu.dma_semaphore, #tpu.memory_space<semaphore_mem>>)
      %c6_i32 = arith.constant 6 : i32
      %c1_i32_64 = arith.constant 1 : i32
      %111 = arith.muli %c6_i32, %c1_i32_64 : i32
      %c0_i32_65 = arith.constant 0 : i32
      %112 = arith.addi %c0_i32_65, %111 : i32
      %113 = arith.addi %50, %112 : i32
      %114 = arith.index_cast %113 : i32 to index
      %115 = memref.load %arg2[%114] : memref<16xi32, #tpu.memory_space<smem>>
      %c0_i32_66 = arith.constant 0 : i32
      %c0_i32_67 = arith.constant 0 : i32
      %c0_i32_68 = arith.constant 0 : i32
      %116 = tpu.memref_slice %arg3[%115, %c0_i32_68] : memref<64x128xf32, #tpu.memory_space<any>> -> memref<1x128xf32, #tpu.memory_space<any>>
      %c0_i32_69 = arith.constant 0 : i32
      %117 = tpu.memref_slice %arg8[%c0_i32_66, %112, %c0_i32_69] : memref<2x8x128xf32, #tpu.memory_space<vmem>> -> memref<1x1x128xf32, #tpu.memory_space<vmem>>
      %118 = tpu.memref_squeeze %117 : memref<1x1x128xf32, #tpu.memory_space<vmem>> -> memref<1x128xf32, #tpu.memory_space<vmem>>
      %119 = tpu.memref_slice %arg9[%c0_i32_67] : memref<2x!tpu.dma_semaphore, #tpu.memory_space<semaphore_mem>> -> memref<1x!tpu.dma_semaphore, #tpu.memory_space<semaphore_mem>>
      %120 = tpu.memref_squeeze %119 : memref<1x!tpu.dma_semaphore, #tpu.memory_space<semaphore_mem>> -> memref<!tpu.dma_semaphore, #tpu.memory_space<semaphore_mem>>
      tpu.enqueue_dma source(%116 : memref<1x128xf32, #tpu.memory_space<any>>) target(%118 : memref<1x128xf32, #tpu.memory_space<vmem>>) target_semaphore(%120 : memref<!tpu.dma_semaphore, #tpu.memory_space<semaphore_mem>>)
      %c7_i32 = arith.constant 7 : i32
      %c1_i32_70 = arith.constant 1 : i32
      %121 = arith.muli %c7_i32, %c1_i32_70 : i32
      %c0_i32_71 = arith.constant 0 : i32
      %122 = arith.addi %c0_i32_71, %121 : i32
      %123 = arith.addi %50, %122 : i32
      %124 = arith.index_cast %123 : i32 to index
      %125 = memref.load %arg2[%124] : memref<16xi32, #tpu.memory_space<smem>>
      %c0_i32_72 = arith.constant 0 : i32
      %c0_i32_73 = arith.constant 0 : i32
      %c0_i32_74 = arith.constant 0 : i32
      %126 = tpu.memref_slice %arg3[%125, %c0_i32_74] : memref<64x128xf32, #tpu.memory_space<any>> -> memref<1x128xf32, #tpu.memory_space<any>>
      %c0_i32_75 = arith.constant 0 : i32
      %127 = tpu.memref_slice %arg8[%c0_i32_72, %122, %c0_i32_75] : memref<2x8x128xf32, #tpu.memory_space<vmem>> -> memref<1x1x128xf32, #tpu.memory_space<vmem>>
      %128 = tpu.memref_squeeze %127 : memref<1x1x128xf32, #tpu.memory_space<vmem>> -> memref<1x128xf32, #tpu.memory_space<vmem>>
      %129 = tpu.memref_slice %arg9[%c0_i32_73] : memref<2x!tpu.dma_semaphore, #tpu.memory_space<semaphore_mem>> -> memref<1x!tpu.dma_semaphore, #tpu.memory_space<semaphore_mem>>
      %130 = tpu.memref_squeeze %129 : memref<1x!tpu.dma_semaphore, #tpu.memory_space<semaphore_mem>> -> memref<!tpu.dma_semaphore, #tpu.memory_space<semaphore_mem>>
      tpu.enqueue_dma source(%126 : memref<1x128xf32, #tpu.memory_space<any>>) target(%128 : memref<1x128xf32, #tpu.memory_space<vmem>>) target_semaphore(%130 : memref<!tpu.dma_semaphore, #tpu.memory_space<semaphore_mem>>)
      %c8_i32_76 = arith.constant 8 : i32
    } else {
    }
    %c1_i32_5 = arith.constant 1 : i32
    %13 = arith.addi %arg1, %c1_i32_5 : i32
    %c2_i32_6 = arith.constant 2 : i32
    %14 = arith.cmpi slt, %13, %c2_i32_6 : i32
    %15 = arith.extui %14 : i1 to i32
    %c0_i32_7 = arith.constant 0 : i32
    %16 = arith.cmpi ne, %15, %c0_i32_7 : i32
    scf.if %16 {
      %c1_i32_24 = arith.constant 1 : i32
      %49 = arith.addi %arg1, %c1_i32_24 : i32
      %c1_i32_25 = arith.constant 1 : i32
      %50 = arith.subi %c1_i32_25, %9 : i32
      %c8_i32 = arith.constant 8 : i32
      %51 = arith.muli %49, %c8_i32 : i32
      %c8_i32_26 = arith.constant 8 : i32
      %52 = arith.muli %arg0, %c8_i32_26 : i32
      %53 = arith.addi %51, %52 : i32
      %c0_i32_27 = arith.constant 0 : i32
      %c1_i32_28 = arith.constant 1 : i32
      %54 = arith.muli %c0_i32_27, %c1_i32_28 : i32
      %c0_i32_29 = arith.constant 0 : i32
      %55 = arith.addi %c0_i32_29, %54 : i32
      %56 = arith.addi %53, %55 : i32
      %57 = arith.index_cast %56 : i32 to index
      %58 = memref.load %arg2[%57] : memref<16xi32, #tpu.memory_space<smem>>
      %c0_i32_30 = arith.constant 0 : i32
      %59 = tpu.memref_slice %arg3[%58, %c0_i32_30] : memref<64x128xf32, #tpu.memory_space<any>> -> memref<1x128xf32, #tpu.memory_space<any>>
      %c0_i32_31 = arith.constant 0 : i32
      %60 = tpu.memref_slice %arg8[%50, %55, %c0_i32_31] : memref<2x8x128xf32, #tpu.memory_space<vmem>> -> memref<1x1x128xf32, #tpu.memory_space<vmem>>
      %61 = tpu.memref_squeeze %60 : memref<1x1x128xf32, #tpu.memory_space<vmem>> -> memref<1x128xf32, #tpu.memory_space<vmem>>
      %62 = tpu.memref_slice %arg9[%50] : memref<2x!tpu.dma_semaphore, #tpu.memory_space<semaphore_mem>> -> memref<1x!tpu.dma_semaphore, #tpu.memory_space<semaphore_mem>>
      %63 = tpu.memref_squeeze %62 : memref<1x!tpu.dma_semaphore, #tpu.memory_space<semaphore_mem>> -> memref<!tpu.dma_semaphore, #tpu.memory_space<semaphore_mem>>
      tpu.enqueue_dma source(%59 : memref<1x128xf32, #tpu.memory_space<any>>) target(%61 : memref<1x128xf32, #tpu.memory_space<vmem>>) target_semaphore(%63 : memref<!tpu.dma_semaphore, #tpu.memory_space<semaphore_mem>>)
      %c1_i32_32 = arith.constant 1 : i32
      %c1_i32_33 = arith.constant 1 : i32
      %64 = arith.muli %c1_i32_32, %c1_i32_33 : i32
      %c0_i32_34 = arith.constant 0 : i32
      %65 = arith.addi %c0_i32_34, %64 : i32
      %66 = arith.addi %53, %65 : i32
      %67 = arith.index_cast %66 : i32 to index
      %68 = memref.load %arg2[%67] : memref<16xi32, #tpu.memory_space<smem>>
      %c0_i32_35 = arith.constant 0 : i32
      %69 = tpu.memref_slice %arg3[%68, %c0_i32_35] : memref<64x128xf32, #tpu.memory_space<any>> -> memref<1x128xf32, #tpu.memory_space<any>>
      %c0_i32_36 = arith.constant 0 : i32
      %70 = tpu.memref_slice %arg8[%50, %65, %c0_i32_36] : memref<2x8x128xf32, #tpu.memory_space<vmem>> -> memref<1x1x128xf32, #tpu.memory_space<vmem>>
      %71 = tpu.memref_squeeze %70 : memref<1x1x128xf32, #tpu.memory_space<vmem>> -> memref<1x128xf32, #tpu.memory_space<vmem>>
      %72 = tpu.memref_slice %arg9[%50] : memref<2x!tpu.dma_semaphore, #tpu.memory_space<semaphore_mem>> -> memref<1x!tpu.dma_semaphore, #tpu.memory_space<semaphore_mem>>
      %73 = tpu.memref_squeeze %72 : memref<1x!tpu.dma_semaphore, #tpu.memory_space<semaphore_mem>> -> memref<!tpu.dma_semaphore, #tpu.memory_space<semaphore_mem>>
      tpu.enqueue_dma source(%69 : memref<1x128xf32, #tpu.memory_space<any>>) target(%71 : memref<1x128xf32, #tpu.memory_space<vmem>>) target_semaphore(%73 : memref<!tpu.dma_semaphore, #tpu.memory_space<semaphore_mem>>)
      %c2_i32_37 = arith.constant 2 : i32
      %c1_i32_38 = arith.constant 1 : i32
      %74 = arith.muli %c2_i32_37, %c1_i32_38 : i32
      %c0_i32_39 = arith.constant 0 : i32
      %75 = arith.addi %c0_i32_39, %74 : i32
      %76 = arith.addi %53, %75 : i32
      %77 = arith.index_cast %76 : i32 to index
      %78 = memref.load %arg2[%77] : memref<16xi32, #tpu.memory_space<smem>>
      %c0_i32_40 = arith.constant 0 : i32
      %79 = tpu.memref_slice %arg3[%78, %c0_i32_40] : memref<64x128xf32, #tpu.memory_space<any>> -> memref<1x128xf32, #tpu.memory_space<any>>
      %c0_i32_41 = arith.constant 0 : i32
      %80 = tpu.memref_slice %arg8[%50, %75, %c0_i32_41] : memref<2x8x128xf32, #tpu.memory_space<vmem>> -> memref<1x1x128xf32, #tpu.memory_space<vmem>>
      %81 = tpu.memref_squeeze %80 : memref<1x1x128xf32, #tpu.memory_space<vmem>> -> memref<1x128xf32, #tpu.memory_space<vmem>>
      %82 = tpu.memref_slice %arg9[%50] : memref<2x!tpu.dma_semaphore, #tpu.memory_space<semaphore_mem>> -> memref<1x!tpu.dma_semaphore, #tpu.memory_space<semaphore_mem>>
      %83 = tpu.memref_squeeze %82 : memref<1x!tpu.dma_semaphore, #tpu.memory_space<semaphore_mem>> -> memref<!tpu.dma_semaphore, #tpu.memory_space<semaphore_mem>>
      tpu.enqueue_dma source(%79 : memref<1x128xf32, #tpu.memory_space<any>>) target(%81 : memref<1x128xf32, #tpu.memory_space<vmem>>) target_semaphore(%83 : memref<!tpu.dma_semaphore, #tpu.memory_space<semaphore_mem>>)
      %c3_i32 = arith.constant 3 : i32
      %c1_i32_42 = arith.constant 1 : i32
      %84 = arith.muli %c3_i32, %c1_i32_42 : i32
      %c0_i32_43 = arith.constant 0 : i32
      %85 = arith.addi %c0_i32_43, %84 : i32
      %86 = arith.addi %53, %85 : i32
      %87 = arith.index_cast %86 : i32 to index
      %88 = memref.load %arg2[%87] : memref<16xi32, #tpu.memory_space<smem>>
      %c0_i32_44 = arith.constant 0 : i32
      %89 = tpu.memref_slice %arg3[%88, %c0_i32_44] : memref<64x128xf32, #tpu.memory_space<any>> -> memref<1x128xf32, #tpu.memory_space<any>>
      %c0_i32_45 = arith.constant 0 : i32
      %90 = tpu.memref_slice %arg8[%50, %85, %c0_i32_45] : memref<2x8x128xf32, #tpu.memory_space<vmem>> -> memref<1x1x128xf32, #tpu.memory_space<vmem>>
      %91 = tpu.memref_squeeze %90 : memref<1x1x128xf32, #tpu.memory_space<vmem>> -> memref<1x128xf32, #tpu.memory_space<vmem>>
      %92 = tpu.memref_slice %arg9[%50] : memref<2x!tpu.dma_semaphore, #tpu.memory_space<semaphore_mem>> -> memref<1x!tpu.dma_semaphore, #tpu.memory_space<semaphore_mem>>
      %93 = tpu.memref_squeeze %92 : memref<1x!tpu.dma_semaphore, #tpu.memory_space<semaphore_mem>> -> memref<!tpu.dma_semaphore, #tpu.memory_space<semaphore_mem>>
      tpu.enqueue_dma source(%89 : memref<1x128xf32, #tpu.memory_space<any>>) target(%91 : memref<1x128xf32, #tpu.memory_space<vmem>>) target_semaphore(%93 : memref<!tpu.dma_semaphore, #tpu.memory_space<semaphore_mem>>)
      %c4_i32 = arith.constant 4 : i32
      %c1_i32_46 = arith.constant 1 : i32
      %94 = arith.muli %c4_i32, %c1_i32_46 : i32
      %c0_i32_47 = arith.constant 0 : i32
      %95 = arith.addi %c0_i32_47, %94 : i32
      %96 = arith.addi %53, %95 : i32
      %97 = arith.index_cast %96 : i32 to index
      %98 = memref.load %arg2[%97] : memref<16xi32, #tpu.memory_space<smem>>
      %c0_i32_48 = arith.constant 0 : i32
      %99 = tpu.memref_slice %arg3[%98, %c0_i32_48] : memref<64x128xf32, #tpu.memory_space<any>> -> memref<1x128xf32, #tpu.memory_space<any>>
      %c0_i32_49 = arith.constant 0 : i32
      %100 = tpu.memref_slice %arg8[%50, %95, %c0_i32_49] : memref<2x8x128xf32, #tpu.memory_space<vmem>> -> memref<1x1x128xf32, #tpu.memory_space<vmem>>
      %101 = tpu.memref_squeeze %100 : memref<1x1x128xf32, #tpu.memory_space<vmem>> -> memref<1x128xf32, #tpu.memory_space<vmem>>
      %102 = tpu.memref_slice %arg9[%50] : memref<2x!tpu.dma_semaphore, #tpu.memory_space<semaphore_mem>> -> memref<1x!tpu.dma_semaphore, #tpu.memory_space<semaphore_mem>>
      %103 = tpu.memref_squeeze %102 : memref<1x!tpu.dma_semaphore, #tpu.memory_space<semaphore_mem>> -> memref<!tpu.dma_semaphore, #tpu.memory_space<semaphore_mem>>
      tpu.enqueue_dma source(%99 : memref<1x128xf32, #tpu.memory_space<any>>) target(%101 : memref<1x128xf32, #tpu.memory_space<vmem>>) target_semaphore(%103 : memref<!tpu.dma_semaphore, #tpu.memory_space<semaphore_mem>>)
      %c5_i32 = arith.constant 5 : i32
      %c1_i32_50 = arith.constant 1 : i32
      %104 = arith.muli %c5_i32, %c1_i32_50 : i32
      %c0_i32_51 = arith.constant 0 : i32
      %105 = arith.addi %c0_i32_51, %104 : i32
      %106 = arith.addi %53, %105 : i32
      %107 = arith.index_cast %106 : i32 to index
      %108 = memref.load %arg2[%107] : memref<16xi32, #tpu.memory_space<smem>>
      %c0_i32_52 = arith.constant 0 : i32
      %109 = tpu.memref_slice %arg3[%108, %c0_i32_52] : memref<64x128xf32, #tpu.memory_space<any>> -> memref<1x128xf32, #tpu.memory_space<any>>
      %c0_i32_53 = arith.constant 0 : i32
      %110 = tpu.memref_slice %arg8[%50, %105, %c0_i32_53] : memref<2x8x128xf32, #tpu.memory_space<vmem>> -> memref<1x1x128xf32, #tpu.memory_space<vmem>>
      %111 = tpu.memref_squeeze %110 : memref<1x1x128xf32, #tpu.memory_space<vmem>> -> memref<1x128xf32, #tpu.memory_space<vmem>>
      %112 = tpu.memref_slice %arg9[%50] : memref<2x!tpu.dma_semaphore, #tpu.memory_space<semaphore_mem>> -> memref<1x!tpu.dma_semaphore, #tpu.memory_space<semaphore_mem>>
      %113 = tpu.memref_squeeze %112 : memref<1x!tpu.dma_semaphore, #tpu.memory_space<semaphore_mem>> -> memref<!tpu.dma_semaphore, #tpu.memory_space<semaphore_mem>>
      tpu.enqueue_dma source(%109 : memref<1x128xf32, #tpu.memory_space<any>>) target(%111 : memref<1x128xf32, #tpu.memory_space<vmem>>) target_semaphore(%113 : memref<!tpu.dma_semaphore, #tpu.memory_space<semaphore_mem>>)
      %c6_i32 = arith.constant 6 : i32
      %c1_i32_54 = arith.constant 1 : i32
      %114 = arith.muli %c6_i32, %c1_i32_54 : i32
      %c0_i32_55 = arith.constant 0 : i32
      %115 = arith.addi %c0_i32_55, %114 : i32
      %116 = arith.addi %53, %115 : i32
      %117 = arith.index_cast %116 : i32 to index
      %118 = memref.load %arg2[%117] : memref<16xi32, #tpu.memory_space<smem>>
      %c0_i32_56 = arith.constant 0 : i32
      %119 = tpu.memref_slice %arg3[%118, %c0_i32_56] : memref<64x128xf32, #tpu.memory_space<any>> -> memref<1x128xf32, #tpu.memory_space<any>>
      %c0_i32_57 = arith.constant 0 : i32
      %120 = tpu.memref_slice %arg8[%50, %115, %c0_i32_57] : memref<2x8x128xf32, #tpu.memory_space<vmem>> -> memref<1x1x128xf32, #tpu.memory_space<vmem>>
      %121 = tpu.memref_squeeze %120 : memref<1x1x128xf32, #tpu.memory_space<vmem>> -> memref<1x128xf32, #tpu.memory_space<vmem>>
      %122 = tpu.memref_slice %arg9[%50] : memref<2x!tpu.dma_semaphore, #tpu.memory_space<semaphore_mem>> -> memref<1x!tpu.dma_semaphore, #tpu.memory_space<semaphore_mem>>
      %123 = tpu.memref_squeeze %122 : memref<1x!tpu.dma_semaphore, #tpu.memory_space<semaphore_mem>> -> memref<!tpu.dma_semaphore, #tpu.memory_space<semaphore_mem>>
      tpu.enqueue_dma source(%119 : memref<1x128xf32, #tpu.memory_space<any>>) target(%121 : memref<1x128xf32, #tpu.memory_space<vmem>>) target_semaphore(%123 : memref<!tpu.dma_semaphore, #tpu.memory_space<semaphore_mem>>)
      %c7_i32 = arith.constant 7 : i32
      %c1_i32_58 = arith.constant 1 : i32
      %124 = arith.muli %c7_i32, %c1_i32_58 : i32
      %c0_i32_59 = arith.constant 0 : i32
      %125 = arith.addi %c0_i32_59, %124 : i32
      %126 = arith.addi %53, %125 : i32
      %127 = arith.index_cast %126 : i32 to index
      %128 = memref.load %arg2[%127] : memref<16xi32, #tpu.memory_space<smem>>
      %c0_i32_60 = arith.constant 0 : i32
      %129 = tpu.memref_slice %arg3[%128, %c0_i32_60] : memref<64x128xf32, #tpu.memory_space<any>> -> memref<1x128xf32, #tpu.memory_space<any>>
      %c0_i32_61 = arith.constant 0 : i32
      %130 = tpu.memref_slice %arg8[%50, %125, %c0_i32_61] : memref<2x8x128xf32, #tpu.memory_space<vmem>> -> memref<1x1x128xf32, #tpu.memory_space<vmem>>
      %131 = tpu.memref_squeeze %130 : memref<1x1x128xf32, #tpu.memory_space<vmem>> -> memref<1x128xf32, #tpu.memory_space<vmem>>
      %132 = tpu.memref_slice %arg9[%50] : memref<2x!tpu.dma_semaphore, #tpu.memory_space<semaphore_mem>> -> memref<1x!tpu.dma_semaphore, #tpu.memory_space<semaphore_mem>>
      %133 = tpu.memref_squeeze %132 : memref<1x!tpu.dma_semaphore, #tpu.memory_space<semaphore_mem>> -> memref<!tpu.dma_semaphore, #tpu.memory_space<semaphore_mem>>
      tpu.enqueue_dma source(%129 : memref<1x128xf32, #tpu.memory_space<any>>) target(%131 : memref<1x128xf32, #tpu.memory_space<vmem>>) target_semaphore(%133 : memref<!tpu.dma_semaphore, #tpu.memory_space<semaphore_mem>>)
      %c8_i32_62 = arith.constant 8 : i32
    } else {
    }
    %c0_i32_8 = arith.constant 0 : i32
    %c0_i32_9 = arith.constant 0 : i32
    %17 = tpu.memref_slice %arg3[%c0_i32_8, %c0_i32_9] : memref<64x128xf32, #tpu.memory_space<any>> -> memref<8x128xf32, #tpu.memory_space<any>>
    %c0_i32_10 = arith.constant 0 : i32
    %c0_i32_11 = arith.constant 0 : i32
    %18 = tpu.memref_slice %arg8[%9, %c0_i32_10, %c0_i32_11] : memref<2x8x128xf32, #tpu.memory_space<vmem>> -> memref<1x8x128xf32, #tpu.memory_space<vmem>>
    %19 = tpu.memref_squeeze %18 : memref<1x8x128xf32, #tpu.memory_space<vmem>> -> memref<8x128xf32, #tpu.memory_space<vmem>>
    %20 = tpu.memref_slice %arg9[%9] : memref<2x!tpu.dma_semaphore, #tpu.memory_space<semaphore_mem>> -> memref<1x!tpu.dma_semaphore, #tpu.memory_space<semaphore_mem>>
    %21 = tpu.memref_squeeze %20 : memref<1x!tpu.dma_semaphore, #tpu.memory_space<semaphore_mem>> -> memref<!tpu.dma_semaphore, #tpu.memory_space<semaphore_mem>>
    tpu.wait_dma2 semaphore(%21 : memref<!tpu.dma_semaphore, #tpu.memory_space<semaphore_mem>>) src(%17 : memref<8x128xf32, #tpu.memory_space<any>>) dst(%19 : memref<8x128xf32, #tpu.memory_space<vmem>>)
    %c0 = arith.constant 0 : index
    %c0_12 = arith.constant 0 : index
    %22 = vector.load %arg5[%c0, %c0_12] : memref<8x1xi32, #tpu.memory_space<vmem>>, vector<8x1xi32>
    %c1 = arith.constant 1 : index
    %c0_13 = arith.constant 0 : index
    %23 = vector.load %arg4[%c1, %c0_13] : memref<8x128xf32, #tpu.memory_space<vmem>>, vector<1x128xf32>
    %c2 = arith.constant 2 : index
    %c0_14 = arith.constant 0 : index
    %24 = vector.load %arg4[%c2, %c0_14] : memref<8x128xf32, #tpu.memory_space<vmem>>, vector<1x128xf32>
    %c1_i32_15 = arith.constant 1 : i32
    %25 = vector.broadcast %c1_i32_15 : i32 to vector<8x1xi32>
    %26 = arith.cmpi eq, %22, %25 : vector<8x1xi32>
    %cst = arith.constant 0.000000e+00 : f32
    %27 = vector.shape_cast %26 : vector<8x1xi1> to vector<8x1xi1>
    %28 = vector.broadcast %27 : vector<8x1xi1> to vector<8x128xi1>
    %29 = vector.shape_cast %23 : vector<1x128xf32> to vector<1x128xf32>
    %30 = vector.broadcast %29 : vector<1x128xf32> to vector<8x128xf32>
    %31 = vector.broadcast %cst : f32 to vector<8x128xf32>
    %32 = arith.select %28, %30, %31 : vector<8x128xi1>, vector<8x128xf32>
    %c2_i32_16 = arith.constant 2 : i32
    %33 = vector.broadcast %c2_i32_16 : i32 to vector<8x1xi32>
    %34 = arith.cmpi eq, %22, %33 : vector<8x1xi32>
    %cst_17 = arith.constant 0.000000e+00 : f32
    %35 = vector.shape_cast %34 : vector<8x1xi1> to vector<8x1xi1>
    %36 = vector.broadcast %35 : vector<8x1xi1> to vector<8x128xi1>
    %37 = vector.shape_cast %24 : vector<1x128xf32> to vector<1x128xf32>
    %38 = vector.broadcast %37 : vector<1x128xf32> to vector<8x128xf32>
    %39 = vector.broadcast %cst_17 : f32 to vector<8x128xf32>
    %40 = arith.select %36, %38, %39 : vector<8x128xi1>, vector<8x128xf32>
    %41 = arith.addf %32, %40 : vector<8x128xf32>
    %42 = arith.index_cast %9 : i32 to index
    %c0_18 = arith.constant 0 : index
    %c0_19 = arith.constant 0 : index
    %43 = vector.load %arg8[%42, %c0_18, %c0_19] : memref<2x8x128xf32, #tpu.memory_space<vmem>>, vector<1x8x128xf32>
    %44 = vector.shape_cast %43 : vector<1x8x128xf32> to vector<8x128xf32>
    %45 = arith.addf %44, %41 : vector<8x128xf32>
    %c0_20 = arith.constant 0 : index
    %c0_21 = arith.constant 0 : index
    %46 = vector.load %arg6[%c0_20, %c0_21] : memref<8x128xf32, #tpu.memory_space<vmem>>, vector<8x128xf32>
    %47 = arith.addf %45, %46 : vector<8x128xf32>
    %c0_22 = arith.constant 0 : index
    %c0_23 = arith.constant 0 : index
    %48 = vector.load %arg7[%c0_22, %c0_23] : memref<8x128xf32, #tpu.memory_space<vmem>>, vector<8x128xf32>
    tpu.vector_store %arg7[%c0_22, %c0_23], %47 {strides = array<i32>} : memref<8x128xf32, #tpu.memory_space<vmem>>, vector<8x128xf32>,
    return
  }
  func.func @transform_1(%arg0: i32, %arg1: i32, %arg2: memref<16xi32, #tpu.memory_space<smem>>) -> (i32, i32) {
    %c0_i32 = arith.constant 0 : i32
    %c0_i32_0 = arith.constant 0 : i32
    %c0_i32_1 = arith.constant 0 : i32
    return %c0_i32, %c0_i32_0 : i32, i32
  }
  func.func @transform_2(%arg0: i32, %arg1: i32, %arg2: memref<16xi32, #tpu.memory_space<smem>>) -> (i32, i32) {
    %c1_i32 = arith.constant 1 : i32
    %0 = arith.muli %arg1, %c1_i32 : i32
    %1 = arith.addi %0, %arg0 : i32
    %c0_i32 = arith.constant 0 : i32
    %c0_i32_0 = arith.constant 0 : i32
    return %1, %c0_i32 : i32, i32
  }
  func.func @transform_3(%arg0: i32, %arg1: i32, %arg2: memref<16xi32, #tpu.memory_space<smem>>) -> (i32, i32) {
    %c0_i32 = arith.constant 0 : i32
    %c0_i32_0 = arith.constant 0 : i32
    return %arg0, %c0_i32 : i32, i32
  }
  func.func @transform_4(%arg0: i32, %arg1: i32, %arg2: memref<16xi32, #tpu.memory_space<smem>>) -> (i32, i32) {
    %c1_i32 = arith.constant 1 : i32
    %0 = arith.muli %arg1, %c1_i32 : i32
    %1 = arith.addi %0, %arg0 : i32
    %c0_i32 = arith.constant 0 : i32
    %c0_i32_0 = arith.constant 0 : i32
    return %1, %c0_i32 : i32, i32
  }
}

</mosaic_0001>

<bundles_post_ra>
// kernel: bert_embedding.1
= control target key start
LH: loop header
LB: loop body
LE: loop exit
PB: predicated region body
PF: predicated region fallthrough
CT: control target
= control target key end

     0   :  { %s1863_s0 = inlined_call_operand.vmem [shape: s32[16], index: 0, kind: input, shape index: {}]   ;;  %s1864_s1 = inlined_call_operand.vmem [shape: f32[64,128], index: 1, kind: input, shape index: {}]   ;;  %s1865_s2 = inlined_call_operand.vmem [shape: f32[8,128], index: 2, kind: input, shape index: {}]   ;;  %s1866_s3 = inlined_call_operand.vmem [shape: s32[16,1], index: 3, kind: input, shape index: {}]   ;;  %s1867_s4 = inlined_call_operand.vmem [shape: f32[8,128], index: 4, kind: input, shape index: {}]   ;;  %s1868_s5 = inlined_call_operand.hbm [shape: f32[16,128], index: 5, kind: output, shape index: {}]  }
   0x1   :  { %1870 = sst [smem:[#allocation27_spill]] %s1866_s3  ;;  %s10_s20 = sshll.u32 %s1863_s0, 4  ;;  %s11_s20 = int_to_ptr.vmem [resolvable:$true] %s10_s20 }
   0x2   :  { %s1522_s21 = scalar_lea.vmem %s11_s20, 16  ;;  %p1527_p1 = scmp.lt.s32.totalorder %s11_s20, %s11_s20 }
   0x3   :  { %p1523_p0 = scmp.ne.s32.totalorder %s11_s20, %s1522_s21  ;;  %p1528_p2 = scmp.lt.s32.totalorder %s1522_s21, %s1522_s21 }
   0x5   :  { %p1529_p3 = por %p1528_p2, %p1527_p1 }
   0x7   :  { %p1530_p4 = pnand %p1529_p3, %p1523_p0 }
   0x9   :  { %1533 = shalt.err (!%p1530_p4)  }
   0xa   :  { %s1616_s22 = smov [#allocation5]  }
   0xb   :  { %13 = dma.vmem_to_smem %s11_s20, 16, %s1616_s22, [#allocation4] }
   0xc   :  { %1584 = dma.done.wait [#allocation4], 16 }
   0xd   :  { %1585 = vsyncadd [#allocation4], 4294967280 }
   0xe   :  { %15 = sfence }
   0xf   :  { %16 = vsyncpa [#allocation7], 0 }
  0x10   :  { %18 = vsyncpa [#allocation7 + $0x1], 0  ;;  %s1652_s23 = smov 0   ;;  %s1654_s24 = smov 0  }
  0x11   :  { %s1656_s0 = smov 0   ;;  %s1658_s25 = smov 0  }
  0x12   :  { %s1660_s26 = smov 0   ;;  %s1662_s27 = smov 0  }
  0x13 LB: > { %s1410_s28 = sadd.s32 4294967295, %s1614_s27   ;;  %s1411_s29 = sadd.s32 4294967294, %s1614_s27   ;;  %s1614_s27 = sphi %s1662_s27, %s24_s27   ;;  %s1610_s26 = sphi %s1660_s26, %s1881_s26   ;;  %s1606_s25 = sphi %s1658_s25, %s1880_s25   ;;  %s1602_s0 = sphi %s1656_s0, %s1879_s0   ;;  %s1598_s24 = sphi %s1654_s24, %s1878_s24   ;;  %s1594_s23 = sphi %s1652_s23, %s1877_s23  }
  0x14   : > { %s33_s30 = sadd.s32 1, %s1610_s26  ;;  %s120_s6 = sadd.s32 1, %s1602_s0 }
  0x15   : > { %p34_p5 = scmp.ge.s32.totalorder %s33_s30, 2  ;;  %p130_p6 = scmp.ne.s32.totalorder %s1602_s0, %s1598_s24 }
  0x16   : > { %p131_p7 = scmp.eq.s32.totalorder %s1410_s28, 1  ;;  %p136_p8 = scmp.ne.s32.totalorder %s1598_s24, %s1594_s23 }
  0x17   : > { %s1883_s30 = smov (%p34_p5, %s33_s30), 0  ;;  %p137_p10 = scmp.eq.s32.totalorder %s1411_s29, 1 }
  0x18   : > { %p1692_p9 = por %p131_p7, %p130_p6  ;;  %s117_s8 = ssub.s32 %s1610_s26, %s1883_s30 }
  0x19   : > { %p1415_p11 = scmp.ge.s32.totalorder %s1614_s27, 1  ;;  %p118_p12 = scmp.eq.s32.totalorder %s117_s8, 0 }
  0x1a   : > { %p1699_p13 = por %p137_p10, %p136_p8  ;;  %p174_p0 = scmp.lt.s32.totalorder %s1614_s27, 3 }
  0x1b   : > { %s1705_s10 = scalar_select %p118_p12, %s1602_s0, %s120_s6  }
  0x1c   : > { %p175_p1 = pnand %p1415_p11, %p174_p0 }
  0x1d   : > { %s1869_s11 = sand.u32 (!%p175_p1), 1, %s1598_s24   ;;  %p203_p2 = scmp.lt.s32.totalorder (!%p175_p1), %s1606_s25, 1 }
  0x1e   : > { %178 = sbr.rel (%p175_p1) target bundleno = 351 (0x15f), region = 32  ;;  %s1711_s12 = sshll.u32 (!%p175_p1), %s1869_s11, 3 }
  0x1f   : > { %p213_p3 = scmp.lt.s32.totalorder (!%p175_p1), %s1606_s25, 0  ;;  %s214_s13 = ssub.s32 (!%p175_p1), 0, %s1606_s25 }
  0x20   : > { %s1418_s15 = smin.u32 (!%p175_p1), %s1606_s25, %s214_s13  ;;  %s1873_s3 = sld [smem:[#allocation27_spill]] (!%p175_p1) }
  0x21   : > { %s216_s17 = sand.u32 (!%p175_p1), 1, %s1418_s15   ;;  %p1421_p5 = scmp.ne.s32.totalorder (!%p175_p1), %s1606_s25, 0 }
  0x22   : > { %s217_s21 = ssub.s32 (!%p175_p1), 0, %s216_s17 }
  0x23   : > { %s204_s14 = scalar_select %p203_p2, %s1606_s25, 1 }
  0x24   : > { %s1885_s21 = smov (!%p213_p3, %s217_s21), %s216_s17  ;;  %228 = sbr.rel (%p1421_p5) target bundleno = 112 (0x70), region = 36 }
  0x25   : > { %s1417_s16 = sshll.u32 %s204_s14, 3  ;;  %p1420_p4 = scmp.lt.s32.totalorder %s1885_s21, 0 }
  0x26   : > { %s1720_s20 = scalar_lea.vmem %s1873_s3, %s1417_s16  ;;  %s223_s22 = sadd.s32 2, %s1885_s21 }
  0x27   : > { %s1887_s22 = smov (!%p1420_p4, %s223_s22), %s1885_s21  ;;  %s230_s29 = sld [smem:[#allocation5]] (!%p1421_p5) }
  0x2d   : > { %s231_s13 = scalar_lea.vmem %s1864_s1, %s230_s29 }
  0x2e   : > { %v250_v0 = vld [vmem:[%s231_s13] sm:$0x1] }
  0x2f   : > { %251 = vst [vmem:[#allocation2] sm:$0x1] %v250_v0 }
  0x30   : > { %277 = vsyncadd [#allocation3], 16  ;;  %s1422_s14 = sld [smem:[#allocation5 + $0x1]] }
  0x36   : > { %s280_s17 = scalar_lea.vmem %s1864_s1, %s1422_s14 }
  0x37   : > { %v300_v1 = vld [vmem:[%s280_s17] sm:$0x1] }
  0x38   : > { %301 = vst [vmem:[#allocation2 + $0x1] sm:$0x1] %v300_v1 }
  0x39   : > { %327 = vsyncadd [#allocation3], 16  ;;  %s1423_s18 = sld [smem:[#allocation5 + $0x2]] }
  0x3f   : > { %s330_s11 = scalar_lea.vmem %s1864_s1, %s1423_s18 }
  0x40   : > { %v350_v2 = vld [vmem:[%s330_s11] sm:$0x1] }
  0x41   : > { %351 = vst [vmem:[#allocation2 + $0x2] sm:$0x1] %v350_v2 }
  0x42   : > { %377 = vsyncadd [#allocation3], 16  ;;  %s1424_s29 = sld [smem:[#allocation5 + $0x3]] }
  0x48   : > { %s380_s13 = scalar_lea.vmem %s1864_s1, %s1424_s29 }
  0x49   : > { %v400_v3 = vld [vmem:[%s380_s13] sm:$0x1] }
  0x4a   : > { %401 = vst [vmem:[#allocation2 + $0x3] sm:$0x1] %v400_v3 }
  0x4b   : > { %427 = vsyncadd [#allocation3], 16  ;;  %s1425_s14 = sld [smem:[#allocation5 + $0x4]] }
  0x51   : > { %s430_s17 = scalar_lea.vmem %s1864_s1, %s1425_s14 }
  0x52   : > { %v450_v4 = vld [vmem:[%s430_s17] sm:$0x1] }
  0x53   : > { %451 = vst [vmem:[#allocation2 + $0x4] sm:$0x1] %v450_v4 }
  0x54   : > { %477 = vsyncadd [#allocation3], 16  ;;  %s1426_s18 = sld [smem:[#allocation5 + $0x5]] }
  0x5a   : > { %s480_s21 = scalar_lea.vmem %s1864_s1, %s1426_s18 }
  0x5b   : > { %v500_v5 = vld [vmem:[%s480_s21] sm:$0x1] }
  0x5c   : > { %501 = vst [vmem:[#allocation2 + $0x5] sm:$0x1] %v500_v5 }
  0x5d   : > { %527 = vsyncadd [#allocation3], 16  ;;  %s1427_s29 = sld [smem:[#allocation5 + $0x6]] }
  0x63   : > { %s530_s13 = scalar_lea.vmem %s1864_s1, %s1427_s29 }
  0x64   : > { %v550_v6 = vld [vmem:[%s530_s13] sm:$0x1] }
  0x65   : > { %551 = vst [vmem:[#allocation2 + $0x6] sm:$0x1] %v550_v6 }
  0x66   : > { %577 = vsyncadd [#allocation3], 16  ;;  %s1428_s14 = sld [smem:[#allocation5 + $0x7]] }
  0x6c   : > { %s580_s17 = scalar_lea.vmem %s1864_s1, %s1428_s14 }
  0x6d   : > { %v600_v7 = vld [vmem:[%s580_s17] sm:$0x1] }
  0x6e   : > { %601 = vst [vmem:[#allocation2 + $0x7] sm:$0x1] %v600_v7 }
  0x6f   : > { %627 = vsyncadd [#allocation3], 16 }
  0x70 PF: > { %s628_s18 = sadd.s32 1, %s1606_s25 }
  0x71   : > { %p1429_p6 = scmp.ge.s32.totalorder %s628_s18, 2 }
  0x72   : > { %s1462_s11 = sshll.u32 (!%p1429_p6), %s1606_s25, 3  ;;  %s633_s19 = ssub.s32 (!%p1429_p6), 1, %s1887_s22 }
  0x73   : > { %632 = sbr.rel (%p1429_p6) target bundleno = 196 (0xc4), region = 280  ;;  %s1753_s21 = sadd.s32 (!%p1429_p6), 8, %s1462_s11 }
  0x74   : > { %s637_s29 = sld [smem:[#allocation5 + %s1753_s21]] (!%p1429_p6)  ;;  %s1431_s6 = sshll.u32 (!%p1429_p6), %s633_s19, 3 }
  0x75   : > { %s1759_s15 = scalar_lea.vmem (!%p1429_p6), [#allocation2], %s1431_s6  ;;  %s1762_s16 = scalar_lea.sflag (!%p1429_p6), [#allocation3], %s633_s19 }
  0x7a   : > { %s638_s14 = scalar_lea.vmem %s1864_s1, %s637_s29 }
  0x7b   : > { %v660_v8 = vld [vmem:[%s638_s14] sm:$0x1] }
  0x7c   : > { %661 = vst [vmem:[%s1759_s15] sm:$0x1] %v660_v8 }
  0x7d   : > { %687 = vsyncadd %s1762_s16, 16  ;;  %s688_s17 = sadd.s32 1, %s1753_s21 }
  0x7e   : > { %s689_s18 = sld [smem:[#allocation5 + %s688_s17]] }
  0x84   : > { %s690_s3 = scalar_lea.vmem %s1864_s1, %s689_s18 }
  0x85   : > { %v711_v9 = vld [vmem:[%s690_s3] sm:$0x1] }
  0x86   : > { %1434 = vst [vmem:[%s1759_s15 + $0x1] sm:$0x1] %v711_v9 }
  0x87   : > { %738 = vsyncadd %s1762_s16, 16  ;;  %s739_s29 = sadd.s32 2, %s1753_s21 }
  0x88   : > { %s740_s19 = sld [smem:[#allocation5 + %s739_s29]] }
  0x8e   : > { %s741_s13 = scalar_lea.vmem %s1864_s1, %s740_s19 }
  0x8f   : > { %v762_v10 = vld [vmem:[%s741_s13] sm:$0x1] }
  0x90   : > { %1437 = vst [vmem:[%s1759_s15 + $0x2] sm:$0x1] %v762_v10 }
  0x91   : > { %789 = vsyncadd %s1762_s16, 16  ;;  %s790_s28 = sadd.s32 3, %s1753_s21 }
  0x92   : > { %s791_s14 = sld [smem:[#allocation5 + %s790_s28]] }
  0x98   : > { %s792_s18 = scalar_lea.vmem %s1864_s1, %s791_s14 }
  0x99   : > { %v813_v11 = vld [vmem:[%s792_s18] sm:$0x1] }
  0x9a   : > { %1440 = vst [vmem:[%s1759_s15 + $0x3] sm:$0x1] %v813_v11 }
  0x9b   : > { %840 = vsyncadd %s1762_s16, 16  ;;  %s841_s11 = sadd.s32 4, %s1753_s21 }
  0x9c   : > { %s842_s29 = sld [smem:[#allocation5 + %s841_s11]] }
  0xa2   : > { %s843_s8 = scalar_lea.vmem %s1864_s1, %s842_s29 }
  0xa3   : > { %v864_v12 = vld [vmem:[%s843_s8] sm:$0x1] }
  0xa4   : > { %1443 = vst [vmem:[%s1759_s15 + $0x4] sm:$0x1] %v864_v12 }
  0xa5   : > { %891 = vsyncadd %s1762_s16, 16  ;;  %s892_s13 = sadd.s32 5, %s1753_s21 }
  0xa6   : > { %s893_s28 = sld [smem:[#allocation5 + %s892_s13]] }
  0xac   : > { %s894_s17 = scalar_lea.vmem %s1864_s1, %s893_s28 }
  0xad   : > { %v915_v13 = vld [vmem:[%s894_s17] sm:$0x1] }
  0xae   : > { %1446 = vst [vmem:[%s1759_s15 + $0x5] sm:$0x1] %v915_v13 }
  0xaf   : > { %942 = vsyncadd %s1762_s16, 16  ;;  %s943_s18 = sadd.s32 6, %s1753_s21 }
  0xb0   : > { %s944_s11 = sld [smem:[#allocation5 + %s943_s18]] }
  0xb6   : > { %s945_s6 = scalar_lea.vmem %s1864_s1, %s944_s11 }
  0xb7   : > { %v966_v14 = vld [vmem:[%s945_s6] sm:$0x1] }
  0xb8   : > { %1449 = vst [vmem:[%s1759_s15 + $0x6] sm:$0x1] %v966_v14 }
  0xb9   : > { %993 = vsyncadd %s1762_s16, 16  ;;  %s994_s8 = sadd.s32 7, %s1753_s21 }
  0xba   : > { %s995_s13 = sld [smem:[#allocation5 + %s994_s8]] }
  0xc0   : > { %s996_s3 = scalar_lea.vmem %s1864_s1, %s995_s13 }
  0xc1   : > { %v1017_v15 = vld [vmem:[%s996_s3] sm:$0x1] }
  0xc2   : > { %1452 = vst [vmem:[%s1759_s15 + $0x7] sm:$0x1] %v1017_v15 }
  0xc3   : > { %1044 = vsyncadd %s1762_s16, 16 }
  0xc4 PF: > { %s1453_s17 = sshll.u32 %s1887_s22, 3  ;;  %s1047_s11 = scalar_lea.sflag [#allocation3], %s1887_s22 }
  0xc5   : > { %s1046_s18 = scalar_lea.vmem [#allocation2], %s1453_s17 }
  0xc6   : > { %1586 = dma.done.wait %s1047_s11, 128 }
  0xc7   : > { %1587 = vsyncadd %s1047_s11, 4294967168  ;;  %v1617_v16 = vmov 0   ;;  %v1051_v17 = vld [vmem:[%s1720_s20] sm:$0xff]  ;;  %s1457_s19 = sshll.u32 %s1606_s25, 7  ;;  %s1874_s6 = scalar_lea.vmem [#allocation6], %s1711_s12 }
  0xc8   : > { %1521 = vset.pattern.permute.xlu0 %v1617_v16  ;;  %vm1054_vm0 = vcmp.eq.s32.totalorder %v1051_v17, 1  ;;  %vm1065_vm1 = vcmp.eq.s32.totalorder %v1051_v17, 2  ;;  %v1454_v21 = vld [vmem:[%s1865_s2 + $0x1] ss:$0 sm:$0xff]  ;;  %v1455_v22 = vld [vmem:[%s1865_s2 + $0x2] ss:$0 sm:$0xff]  ;;  %s1095_s14 = scalar_lea.hbm %s1868_s5, %s1457_s19  ;;  %s1875_s3 = smov %s1874_s6 }
  0xc9   : > { %v1055_v18 = vsel %vm1054_vm0, 1, %v1617_v16  ;;  %v1066_v19 = vsel %vm1065_vm1, 1, %v1617_v16  ;;  %v1077_v25 = vld [vmem:[%s1046_s18] sm:$0xff]  ;;  %s1097_s8 = sshll.u32 %s1874_s6, 4  ;;  %s1876_s17 = sand.u32 1, %s1598_s24   ;;  %s1098_s8 = int_to_ptr.vmem [resolvable:$true] %s1097_s8 }
  0xca   : > { %1057 = vperm.xlu0 %1521, %v1055_v18   ;;  %v1079_v28 = vld [vmem:[%s1867_s4] sm:$0xff]  ;;  %s1083_s18 = scalar_lea.sflag [#allocation7], %s1876_s17  ;;  %s1534_s11 = scalar_lea.vmem %s1098_s8, 128 }
  0xcb   : > { %p1535_p7 = scmp.ne.s32.totalorder %s1098_s8, %s1534_s11  ;;  %s1618_s21 = smov [#allocation6]  }
  0xcc   : > { %s1538_s25 = sshll.u32 %s1618_s21, 4  ;;  %s1539_s25 = int_to_ptr.vmem [resolvable:$false] %s1538_s25 }
  0xcd   : > { %p1536_p8 = pnand %p1535_p7, %p1692_p9  ;;  %s1540_s15 = scalar_lea.vmem %s1539_s25, 256 }
  0xce   : > { %1068 = vperm.xlu0 %1521, %v1066_v19   ;;  %p1541_p11 = scmp.lt.s32.totalorder %s1098_s8, %s1539_s25  ;;  %p1542_p12 = scmp.lt.s32.totalorder %s1540_s15, %s1534_s11 }
  0xcf   : > { %p1537_p10 = pneg %p1536_p8 }
  0xd0   : > { %p1543_p0 = por %p1542_p12, %p1541_p11 }
  0xd2   : > { %p1544_p1 = pnand %p1543_p0, %p1537_p10 }
 0x145   : > { %v1058_v20 = vpop.permute.xlu0 %1057 }
 0x146   : > { %vm1059_vm2 = vcmp.eq.s32.totalorder %v1058_v20, 1 }
 0x147   : > { %v1064_v24 = vsel %vm1059_vm2, %v1454_v21, 0.0 }
 0x149   : > { %v1069_v23 = vpop.permute.xlu0 %1068 }
 0x14a   : > { %vm1070_vm3 = vcmp.eq.s32.totalorder %v1069_v23, 1 }
 0x14b   : > { %v1075_v26 = vsel %vm1070_vm3, %v1455_v22, 0.0 }
 0x14c   : > { %v1076_v27 = vadd.f32 %v1075_v26, %v1064_v24 }
 0x14e   : > { %v1078_v29 = vadd.f32 %v1077_v25, %v1076_v27 }
 0x150   : > { %v1080_v30 = vadd.f32 %v1079_v28, %v1078_v29 }
 0x152   : > { %1081 = vst [vmem:[%s1875_s3] sm:$0xff] %v1080_v30 }
 0x153   : > { %1547 = shalt.err (!%p1544_p1)
}
 0x154   : > { %s1548_s22 = scalar_lea.hbm %s1095_s14, 128  ;;  %s1552_s20 = scalar_lea.hbm %s1868_s5, 256 }
 0x155   : > { %p1549_p2 = scmp.ne.s32.totalorder %s1095_s14, %s1548_s22  ;;  %p1553_p5 = scmp.lt.s32.totalorder %s1095_s14, %s1868_s5 }
 0x156   : > { %p1554_p6 = scmp.lt.s32.totalorder %s1552_s20, %s1548_s22 }
 0x157   : > { %p1550_p3 = pnand %p1549_p2, %p1692_p9 }
 0x158   : > { %p1555_p7 = por %p1554_p6, %p1553_p5 }
 0x159   : > { %p1551_p4 = pneg %p1550_p3 }
 0x15b   : > { %p1556_p8 = pnand %p1555_p7, %p1551_p4 }
 0x15d   : > { %1559 = shalt.err (!%p1556_p8)
}
 0x15e   : > { %1464 = dma.vmem_to_hbm [thread:$0]  (%p1692_p9), %s1098_s8, 128, %s1095_s14, %s1083_s18  }
 0x15f PF: > { %p1470_p10 = scmp.ge.s32.totalorder %s1614_s27, 2  ;;  %s1109_s6 = sand.u32 1, %s1594_s23  }
 0x160   : > { %s1110_s13 = scalar_lea.sflag [#allocation7], %s1109_s6 }
 0x161   : > { %p1467_p11 = pnand %p1470_p10, %p1699_p13 }
 0x163   : > { %p1468_p12 = pneg %p1467_p11 }
 0x165   : > { %1589 = dma.done.wait (%p1468_p12), %s1110_s13, 128  }
 0x166   : > { %1591 = vsyncadd (%p1468_p12), %s1110_s13, 4294967168  ;;  %s24_s27 = sadd.s32 1, %s1614_s27   ;;  %s1877_s23 = smov %s1598_s24 }
 0x167   : > { %p21_p0 = scmp.ge.s32.totalorder %s24_s27, 4   ;;  %s1878_s24 = smov %s1602_s0 }
 0x168   : > { %s1879_s0 = smov %s1705_s10  ;;  %s1880_s25 = smov %s1610_s26 }
 0x169   : > { %s1881_s26 = smov %s1883_s30  ;;  %23 = sbr.rel (!%p21_p0) target bundleno = 19 (0x13), region = 753 }
 0x16e   :  { %1115 = vsyncpa [#allocation7], 1 }
 0x16f   :  { %1117 = vsyncpa [#allocation7 + $0x1], 1 }
 0x170   :  { %1118 = vsyncmov [#allocation3] }
 0x173   :  { %s1119_s7 = vpop.sfrf %1118 }
 0x174   :  { %p1460_p9 = scmp.ne.s32.totalorder %s1119_s7, 0 }
 0x176   :  { %1123 = shalt.err (%p1460_p9)  }
 0x177   :  { %1125 = vsyncmov [#allocation3 + $0x1] }
 0x17a   :  { %s1126_s9 = vpop.sfrf %1125 }
 0x17b   :  { %p1461_p13 = scmp.ne.s32.totalorder %s1126_s9, 0 }
 0x17d   :  { %1130 = shalt.err (%p1461_p13)  }

</bundles_post_ra>
